<compile_context>
chip_gen: v7x
topology: tpu7x:2x2x1
jax: 0.10.0
libtpu: 0.0.40
codegen_flags: <defaults>
</compile_context>

<pallas_src>
import jax
import jax.numpy as jnp
from jax.experimental import pallas as pl
from jax.experimental.pallas import tpu as pltpu


def _round_up(n, m):
    return ((n + m - 1) // m) * m


def mlp_kernel(x_ref, w1_ref, b1_ref, w2_ref, b2_ref, w3_ref, b3_ref, o_ref):
    # One batch tile per grid step; all weights/biases are VMEM-resident.
    x = x_ref[...]                                                    # (TB, 5)
    h1 = jnp.dot(x, w1_ref[...],
                 preferred_element_type=jnp.float32) + b1_ref[...]    # (TB, 10)
    h1 = jnp.maximum(h1, 0.0)                                         # ReLU
    h2 = jnp.dot(h1, w2_ref[...],
                 preferred_element_type=jnp.float32) + b2_ref[...]    # (TB, 10)
    h2 = jnp.maximum(h2, 0.0)                                         # ReLU
    out = jnp.dot(h2, w3_ref[...],
                  preferred_element_type=jnp.float32) + b3_ref[...]   # (TB, 2)
    o_ref[...] = out.astype(o_ref.dtype)


def simple_test_model(x, w1, b1, w2, b2, w3, b3, *, block_rows=512):
    """Fused forward pass of SimpleTestModel.

    x:  (B, input_dim)       float32
    w1: (input_dim, hidden)  b1: (1, hidden)
    w2: (hidden, hidden)     b2: (1, hidden)
    w3: (hidden, output)     b3: (1, output)
    returns (B, output_dim) float32
    """
    B, in_dim = x.shape
    out_dim = w3.shape[1]

    # Batch tile: multiple of 8 sublanes, capped at block_rows (VMEM-safe on
    # v5e/v6e/v7x with double buffering).
    tb = min(block_rows, _round_up(max(B, 1), 8))
    b_pad = _round_up(B, tb)
    if b_pad != B:
        x = jnp.pad(x, ((0, b_pad - B), (0, 0)))

    grid = (b_pad // tb,)

    # Weights/biases: whole-array blocks, block index (0,0) for every grid
    # step -> loaded once, reused across all batch tiles.
    def resident(a):
        return pl.BlockSpec(a.shape, lambda i: (0,) * a.ndim)

    out = pl.pallas_call(
        mlp_kernel,
        out_shape=jax.ShapeDtypeStruct((b_pad, out_dim), jnp.float32),
        grid=grid,
        in_specs=[
            pl.BlockSpec((tb, in_dim), lambda i: (i, 0)),   # x: tiled on batch
            resident(w1), resident(b1),
            resident(w2), resident(b2),
            resident(w3), resident(b3),
        ],
        out_specs=pl.BlockSpec((tb, out_dim), lambda i: (i, 0)),
        compiler_params=pltpu.CompilerParams(
            dimension_semantics=("parallel",),   # shard batch loop on v7x's 2 TCs
        ),
    )(x, w1, b1, w2, b2, w3, b3)

    return out[:B] if b_pad != B else out


def init_params(key, input_dim=5, hidden_dim=10, output_dim=2):
    """Deterministic parameter init (mimics nn.Linear's uniform fan-in init)."""
    ks = jax.random.split(key, 6)

    def linear(kw, kb, fan_in, fan_out):
        bound = 1.0 / jnp.sqrt(fan_in)
        w = jax.random.uniform(kw, (fan_in, fan_out), jnp.float32, -bound, bound)
        b = jax.random.uniform(kb, (1, fan_out), jnp.float32, -bound, bound)
        return w, b

    w1, b1 = linear(ks[0], ks[1], input_dim, hidden_dim)
    w2, b2 = linear(ks[2], ks[3], hidden_dim, hidden_dim)
    w3, b3 = linear(ks[4], ks[5], output_dim and hidden_dim, output_dim)
    return w1, b1, w2, b2, w3, b3


def _reference(x, w1, b1, w2, b2, w3, b3):
    h = jnp.maximum(x @ w1 + b1, 0.0)
    h = jnp.maximum(h @ w2 + b2, 0.0)
    return h @ w3 + b3


if __name__ == "__main__":
    key = jax.random.PRNGKey(0)
    k_x, k_x2, k_p = jax.random.split(key, 3)

    batch, input_dim, hidden_dim, output_dim = 8, 5, 10, 2
    params = init_params(k_p, input_dim, hidden_dim, output_dim)

    # Small batch (single tile).
    x = jax.random.normal(k_x, (batch, input_dim), dtype=jnp.float32)
    out = jax.block_until_ready(simple_test_model(x, *params))
    ref = _reference(x, *params)
    assert out.shape == (batch, output_dim)
    assert jnp.allclose(out, ref, atol=1e-5, rtol=1e-5)

    # Ragged larger batch: exercises the batch grid + padding path.
    x2 = jax.random.normal(k_x2, (300, input_dim), dtype=jnp.float32)
    out2 = jax.block_until_ready(simple_test_model(x2, *params, block_rows=128))
    ref2 = _reference(x2, *params)
    assert out2.shape == (300, output_dim)
    assert jnp.allclose(out2, ref2, atol=1e-5, rtol=1e-5)

    print("KERNEL_OK")
</pallas_src>

<mosaic_0001>
module attributes {stable_mosaic.version = 11 : i64} {
  func.func @mlp_kernel(%arg0: i32, %arg1: memref<8x5xf32, #tpu.memory_space<vmem>>, %arg2: memref<5x10xf32, #tpu.memory_space<vmem>>, %arg3: memref<1x10xf32, #tpu.memory_space<vmem>>, %arg4: memref<10x10xf32, #tpu.memory_space<vmem>>, %arg5: memref<1x10xf32, #tpu.memory_space<vmem>>, %arg6: memref<10x2xf32, #tpu.memory_space<vmem>>, %arg7: memref<1x2xf32, #tpu.memory_space<vmem>>, %arg8: memref<8x2xf32, #tpu.memory_space<vmem>>) attributes {dimension_semantics = [#tpu.dimension_semantics<parallel>], iteration_bounds = array<i64: 1>, scalar_prefetch = 0 : i64, scratch_operands = 0 : i64, tpu.core_type = #tpu.core_type<tc>, window_params = [{transform_indices = @transform_0, window_bounds = array<i64: 8, 5>}, {pipeline_mode = #tpu.pipeline_mode<synchronous>, transform_indices = @transform_1, window_bounds = array<i64: 5, 10>}, {pipeline_mode = #tpu.pipeline_mode<synchronous>, transform_indices = @transform_2, window_bounds = array<i64: 1, 10>}, {pipeline_mode = #tpu.pipeline_mode<synchronous>, transform_indices = @transform_3, window_bounds = array<i64: 10, 10>}, {pipeline_mode = #tpu.pipeline_mode<synchronous>, transform_indices = @transform_4, window_bounds = array<i64: 1, 10>}, {pipeline_mode = #tpu.pipeline_mode<synchronous>, transform_indices = @transform_5, window_bounds = array<i64: 10, 2>}, {pipeline_mode = #tpu.pipeline_mode<synchronous>, transform_indices = @transform_6, window_bounds = array<i64: 1, 2>}, {transform_indices = @transform_7, window_bounds = array<i64: 8, 2>}]} {
    %c0 = arith.constant 0 : index
    %c0_0 = arith.constant 0 : index
    %0 = vector.load %arg1[%c0, %c0_0] : memref<8x5xf32, #tpu.memory_space<vmem>>, vector<8x5xf32>
    %c0_1 = arith.constant 0 : index
    %c0_2 = arith.constant 0 : index
    %1 = vector.load %arg2[%c0_1, %c0_2] : memref<5x10xf32, #tpu.memory_space<vmem>>, vector<5x10xf32>
    %cst = arith.constant dense<0.000000e+00> : vector<8x10xf32>
    %2 = tpu.matmul %0, %1, %cst {dimension_numbers = #tpu.dot_dimension_numbers<[1], [0], [0], [1], [0, 0, 1, 1], [], []>} : vector<8x5xf32>, vector<5x10xf32>, vector<8x10xf32> -> vector<8x10xf32>
    %c0_3 = arith.constant 0 : index
    %c0_4 = arith.constant 0 : index
    %3 = vector.load %arg3[%c0_3, %c0_4] : memref<1x10xf32, #tpu.memory_space<vmem>>, vector<1x10xf32>
    %4 = vector.broadcast %3 : vector<1x10xf32> to vector<8x10xf32>
    %5 = arith.addf %2, %4 : vector<8x10xf32>
    %cst_5 = arith.constant 0.000000e+00 : f32
    %6 = vector.broadcast %cst_5 : f32 to vector<8x10xf32>
    %7 = arith.maximumf %5, %6 : vector<8x10xf32>
    %c0_6 = arith.constant 0 : index
    %c0_7 = arith.constant 0 : index
    %8 = vector.load %arg4[%c0_6, %c0_7] : memref<10x10xf32, #tpu.memory_space<vmem>>, vector<10x10xf32>
    %cst_8 = arith.constant dense<0.000000e+00> : vector<8x10xf32>
    %9 = tpu.matmul %7, %8, %cst_8 {dimension_numbers = #tpu.dot_dimension_numbers<[1], [0], [0], [1], [0, 0, 1, 1], [], []>} : vector<8x10xf32>, vector<10x10xf32>, vector<8x10xf32> -> vector<8x10xf32>
    %c0_9 = arith.constant 0 : index
    %c0_10 = arith.constant 0 : index
    %10 = vector.load %arg5[%c0_9, %c0_10] : memref<1x10xf32, #tpu.memory_space<vmem>>, vector<1x10xf32>
    %11 = vector.broadcast %10 : vector<1x10xf32> to vector<8x10xf32>
    %12 = arith.addf %9, %11 : vector<8x10xf32>
    %cst_11 = arith.constant 0.000000e+00 : f32
    %13 = vector.broadcast %cst_11 : f32 to vector<8x10xf32>
    %14 = arith.maximumf %12, %13 : vector<8x10xf32>
    %c0_12 = arith.constant 0 : index
    %c0_13 = arith.constant 0 : index
    %15 = vector.load %arg6[%c0_12, %c0_13] : memref<10x2xf32, #tpu.memory_space<vmem>>, vector<10x2xf32>
    %cst_14 = arith.constant dense<0.000000e+00> : vector<8x2xf32>
    %16 = tpu.matmul %14, %15, %cst_14 {dimension_numbers = #tpu.dot_dimension_numbers<[1], [0], [0], [1], [0, 0, 1, 1], [], []>} : vector<8x10xf32>, vector<10x2xf32>, vector<8x2xf32> -> vector<8x2xf32>
    %c0_15 = arith.constant 0 : index
    %c0_16 = arith.constant 0 : index
    %17 = vector.load %arg7[%c0_15, %c0_16] : memref<1x2xf32, #tpu.memory_space<vmem>>, vector<1x2xf32>
    %18 = vector.broadcast %17 : vector<1x2xf32> to vector<8x2xf32>
    %19 = arith.addf %16, %18 : vector<8x2xf32>
    %c0_17 = arith.constant 0 : index
    %c0_18 = arith.constant 0 : index
    %20 = vector.load %arg8[%c0_17, %c0_18] : memref<8x2xf32, #tpu.memory_space<vmem>>, vector<8x2xf32>
    tpu.vector_store %arg8[%c0_17, %c0_18], %19 {strides = array<i32>} : memref<8x2xf32, #tpu.memory_space<vmem>>, vector<8x2xf32>,
    return
  }
  func.func @transform_0(%arg0: i32) -> (i32, i32) {
    %c0_i32 = arith.constant 0 : i32
    %c0_i32_0 = arith.constant 0 : i32
    return %arg0, %c0_i32 : i32, i32
  }
  func.func @transform_1(%arg0: i32) -> (i32, i32) {
    %c0_i32 = arith.constant 0 : i32
    %c0_i32_0 = arith.constant 0 : i32
    %c0_i32_1 = arith.constant 0 : i32
    return %c0_i32, %c0_i32_0 : i32, i32
  }
  func.func @transform_2(%arg0: i32) -> (i32, i32) {
    %c0_i32 = arith.constant 0 : i32
    %c0_i32_0 = arith.constant 0 : i32
    %c0_i32_1 = arith.constant 0 : i32
    return %c0_i32, %c0_i32_0 : i32, i32
  }
  func.func @transform_3(%arg0: i32) -> (i32, i32) {
    %c0_i32 = arith.constant 0 : i32
    %c0_i32_0 = arith.constant 0 : i32
    %c0_i32_1 = arith.constant 0 : i32
    return %c0_i32, %c0_i32_0 : i32, i32
  }
  func.func @transform_4(%arg0: i32) -> (i32, i32) {
    %c0_i32 = arith.constant 0 : i32
    %c0_i32_0 = arith.constant 0 : i32
    %c0_i32_1 = arith.constant 0 : i32
    return %c0_i32, %c0_i32_0 : i32, i32
  }
  func.func @transform_5(%arg0: i32) -> (i32, i32) {
    %c0_i32 = arith.constant 0 : i32
    %c0_i32_0 = arith.constant 0 : i32
    %c0_i32_1 = arith.constant 0 : i32
    return %c0_i32, %c0_i32_0 : i32, i32
  }
  func.func @transform_6(%arg0: i32) -> (i32, i32) {
    %c0_i32 = arith.constant 0 : i32
    %c0_i32_0 = arith.constant 0 : i32
    %c0_i32_1 = arith.constant 0 : i32
    return %c0_i32, %c0_i32_0 : i32, i32
  }
  func.func @transform_7(%arg0: i32) -> (i32, i32) {
    %c0_i32 = arith.constant 0 : i32
    %c0_i32_0 = arith.constant 0 : i32
    return %arg0, %c0_i32 : i32, i32
  }
}

</mosaic_0001>

<bundles_post_ra>
// kernel: tpu_custom_call.1
= control target key start
LH: loop header
LB: loop body
LE: loop exit
PB: predicated region body
PF: predicated region fallthrough
CT: control target
= control target key end

     0   :  { %12 = vsyncpa [#allocation3], 0  ;;  %s379_s24 = smov [#allocation2]   ;;  %s463_s0 = inlined_call_operand.vmem [shape: f32[8,5], index: 0, kind: input, shape index: {}]   ;;  %s464_s1 = inlined_call_operand.hbm [shape: f32[5,10], index: 1, kind: input, shape index: {}]   ;;  %s465_s2 = inlined_call_operand.vmem [shape: f32[1,10], index: 2, kind: input, shape index: {}]   ;;  %s466_s3 = inlined_call_operand.vmem [shape: f32[10,10], index: 3, kind: input, shape index: {}]   ;;  %s467_s4 = inlined_call_operand.vmem [shape: f32[1,10], index: 4, kind: input, shape index: {}]   ;;  %s468_s5 = inlined_call_operand.vmem [shape: f32[10,2], index: 5, kind: input, shape index: {}]   ;;  %s469_s6 = inlined_call_operand.vmem [shape: f32[1,2], index: 6, kind: input, shape index: {}]   ;;  %s470_s7 = inlined_call_operand.vmem [shape: f32[8,2], index: 7, kind: output, shape index: {}]  }
   0x1   :  { %s21_s25 = sshll.u32 %s379_s24, 4  ;;  %s355_s28 = scalar_lea.hbm %s464_s1, 128  ;;  %s22_s25 = int_to_ptr.vmem [resolvable:$true] %s21_s25 }
   0x2   :  { %p356_p0 = scmp.ne.s32.totalorder %s464_s1, %s355_s28  ;;  %p359_p1 = scmp.lt.u32.totalorder %s355_s28, %s464_s1 }
   0x4   :  { %p361_p2 = pnand %p359_p1, %p356_p0 }
   0x6   :  { %364 = shalt.err (!%p361_p2)
}
   0x7   :  { %s365_s10 = scalar_lea.vmem %s22_s25, 128  ;;  %p370_p4 = scmp.lt.s32.totalorder %s22_s25, %s22_s25 }
   0x8   :  { %p366_p3 = scmp.ne.s32.totalorder %s22_s25, %s365_s10  ;;  %p371_p5 = scmp.lt.s32.totalorder %s365_s10, %s365_s10 }
   0xa   :  { %p372_p6 = por %p371_p5, %p370_p4 }
   0xc   :  { %p373_p7 = pnand %p372_p6, %p366_p3 }
   0xe   :  { %376 = shalt.err (!%p373_p7)
}
   0xf   :  { %24 = dma.hbm_to_vmem [thread:$0]  %s464_s1, 128, %s22_s25, [#allocation3]  }
  0x10   :  { %377 = dma.done.wait [#allocation3], 128  }
  0x11   :  { %378 = vsyncadd [#allocation3], 4294967168  ;;  %v380_v0 = vmov 0.0   ;;  %vm381_vm0 = vmmov 0   ;;  %vm51_vm1 = vcmask 1044480   ;;  %vm47_vm2 = vcmask 39936  }
  0x12   :  { %323 = vmatprep.subr.mxu0 %v380_v0  ;;  %325 = vmatprep.mubr.msk.f32.mxu0 %vm381_vm0, %v380_v0  ;;  %v39_v1 = vld [vmem:[#allocation2] sm:$0x1f]  ;;  %v127_v4 = vld [vmem:[%s466_s3 + $0x8] sm:$0x3]  ;;  %vm139_vm3 = vcmask 1041408   ;;  %v382_v6 = vmov 0.0|0.0  }
  0x13   :  { %332 = vmatprep.mubr.msk.f32.mxu1 %vm381_vm0, %v380_v0  ;;  %v38_v2 = vld [vmem:[%s463_s0] sm:$0xff]  ;;  %324 = vmatpush3.msk.msra.mxu0 %vm51_vm1, %v39_v1  ;;  %vm383_vm4 = vmmov 1   ;;  %vm135_vm6 = vcmask 80896   ;;  %v215_v13 = vld [vmem:[%s468_s5 + $0x8] sm:$0x3]  ;;  %vm299_vm7 = vcmask 15360  }
  0x14   :  { %326 = vmatmul.mubr.msk.f32.vlgmr.msra.gmra.mrb[0].mxu0 %vm47_vm2, %v38_v2  ;;  %v126_v3 = vld [vmem:[%s466_s3] sm:$0xff]  ;;  %342 = vmatprep.subr.bf16.mxu1 %v382_v6  ;;  %vm344_vm5 = vmpackc.low %vm139_vm3, %vm383_vm4 }
  0x15   :  { %339 = vmatprep.mubr.msk.f32.mxu0 %vm381_vm0, %v380_v0  ;;  %v343_v5 = vpack.c.bf16 %v127_v4, %v126_v3  ;;  %346 = vmatprep.subr.bf16.mxu0 %v382_v6  ;;  %v306_v7 = vld [vmem:[%s465_s2] ss:$0 sm:$0xff] }
  0x16   :  { %v214_v12 = vld [vmem:[%s468_s5] sm:$0xff] }
  0x17   :  { %345 = vmatpush3.bf16.msk.msra.mxu1 %vm344_vm5, %v343_v5  ;;  %v347_v14 = vpack.c.bf16 %v215_v13, %v214_v12  ;;  %v309_v15 = vld [vmem:[%s467_s4] ss:$0 sm:$0xff] }
  0x18   :  { %v312_v20 = vld [vmem:[%s469_s6] ss:$0 sm:$0xff] }
  0x19   :  { %349 = vmatpush3.bf16.msk.msra.mxu0 %vm344_vm5, %v347_v14 }
  0xe7   :  { %v121_v8 = vpop.f32.mrb[0].mxu0 }
  0xe8   :  { %v122_v9 = vadd.f32 %v306_v7, %v121_v8  ;;  %v327_v10 = vpop.f32.mrb[1].mxu0 }
  0xea   :  { %v125_v11 = vmax.f32 %v122_v9, 0.0 }
  0xec   :  { %333 = vmatmul.mubr.msk.f32.vlgmr.msra.gmra.mrb[0].mxu1 %vm135_vm6, %v125_v11 }
 0x1bf   :  { %v209_v16 = vpop.f32.mrb[0].mxu1 }
 0x1c0   :  { %v210_v17 = vadd.f32 %v309_v15, %v209_v16  ;;  %v334_v18 = vpop.f32.mrb[1].mxu1 }
 0x1c2   :  { %v213_v19 = vmax.f32 %v210_v17, 0.0 }
 0x1c4   :  { %340 = vmatmul.mubr.msk.f32.vlgmr.msra.gmra.mrb[2].mxu0 %vm135_vm6, %v213_v19 }
 0x297   :  { %v295_v21 = vpop.f32.mrb[2].mxu0 }
 0x298   :  { %v296_v22 = vadd.f32 %v312_v20, %v295_v21  ;;  %v341_v23 = vpop.f32.mrb[3].mxu0 }
 0x29a   :  { %300 = vst.msk [vmem:[%s470_s7] sm:$0xff] %vm299_vm7, %v296_v22 }
 0x29b   :  { %305 = vsyncpa [#allocation3], 1 }

</bundles_post_ra>
